<compile_context>
chip_gen: v7x
topology: tpu7x:2x2x1
jax: 0.10.0
libtpu: 0.0.40
codegen_flags: <defaults>
</compile_context>

<pallas_src>
import functools

import jax
import jax.numpy as jnp
from jax import lax
from jax.experimental import pallas as pl
from jax.experimental.pallas import tpu as pltpu


def _conv_bn_relu_kernel(w_ref, gamma_ref, beta_ref, x_hbm,   # inputs
                         o_ref,                               # output
                         a_ref, xv_ref, dma_sem,              # scratch
                         *, length, ksize, pad, eps, nl_valid):
    # w_ref:     (block_co, K*C_in_pad)  folded conv weight (bf16)
    # gamma_ref: (block_co, 1)           BN weight  (f32)
    # beta_ref:  (block_co, 1)           BN bias    (f32)
    # x_hbm:     (C_in_pad, NL_pad+2p)   channel-major input w/ lane halo (HBM)
    # o_ref:     (block_co, NL_pad)      lane-dense output tile
    # a_ref:     (K*C_in_pad, NL_pad)    im2col slab (bf16), built once
    # xv_ref:    (C_in_pad, NL_pad+2p)   x resident in VMEM (single buffered)
    c_in_pad = xv_ref.shape[0]
    nl_pad = a_ref.shape[1]

    # --- Build the grid-invariant im2col slab exactly once (first grid step).
    # The grid axis is "arbitrary" (sequential), so later steps see the slab.
    @pl.when(pl.program_id(0) == 0)
    def _build_im2col():
        cp = pltpu.make_async_copy(x_hbm, xv_ref, dma_sem)
        cp.start()
        cp.wait()
        lane = lax.broadcasted_iota(jnp.int32, (c_in_pad, nl_pad), 1)
        lpos = lane % length                      # position inside a batch row
        for k in range(ksize):                    # K static taps
            s = k - pad
            # One shifted, in-bounds, full-width slice per tap (the 2*pad lane
            # halo makes every read in range).  pltpu.roll would put this on
            # the XLU, but a static slice is equally cheap here (built once).
            tap = xv_ref[:, k:k + nl_pad]         # (C_in_pad, NL_pad)
            valid = (lpos + s >= 0) & (lpos + s < length) & (lane < nl_valid)
            # Store offset k*C_in_pad is a whole-tile boundary -> aligned vst.
            a_ref[k * c_in_pad:(k + 1) * c_in_pad, :] = jnp.where(
                valid, tap, 0.0).astype(a_ref.dtype)

    # --- One MXU matmul per C_out block: bf16 operands, f32 accumulation.
    y = jnp.dot(w_ref[...], a_ref[...],
                preferred_element_type=jnp.float32)           # (block_co, NL_pad)

    # --- BatchNorm1d training-mode batch statistics (biased variance) in a
    # single pass.  Columns >= nl_valid are exactly zero in y (zero columns of
    # A), so dividing the sums by the true count keeps the statistics exact.
    # Conv bias intentionally omitted: it cancels exactly in (y - mean).
    inv_n = 1.0 / nl_valid
    mean = jnp.sum(y, axis=1, keepdims=True) * inv_n          # (block_co, 1)
    ex2 = jnp.sum(y * y, axis=1, keepdims=True) * inv_n       # (block_co, 1)
    var = jnp.maximum(ex2 - mean * mean, 0.0)
    scale = gamma_ref[...] * lax.rsqrt(var + eps)
    shift = beta_ref[...] - scale * mean

    # Fused ReLU.  Dropout: inference semantics (identity).
    # TODO(synk): training-mode Dropout(p=0.5) uses PyTorch's RNG stream and is
    # not reproduced; a stochastic mask would use pltpu.stateful_bernoulli.
    o_ref[...] = jnp.maximum(y * scale + shift, 0.0).astype(o_ref.dtype)


def conv1d_bn_relu_dropout(x, weight, bias, gamma, beta, *, eps=1e-5,
                           block_co=128, mxu_dtype=jnp.bfloat16,
                           channel_major_out=False):
    """Fused Conv1d('same') + BatchNorm1d(batch stats) + ReLU (+ identity Dropout).

    x: (N, C_in, L); weight: (C_out, C_in, K) (PyTorch Conv1d layout).
    """
    del bias  # Exact no-op: per-channel constants cancel under batch-stat BN.

    n, c_in, length = x.shape
    c_out, c_in_w, ksize = weight.shape
    assert c_in == c_in_w and ksize % 2 == 1 and c_out % 8 == 0
    pad = ksize // 2

    # C_out tile: fill the MXU row dimension, clamp to a divisor of C_out.
    block_co = max(8, min(block_co, c_out))
    while c_out % block_co:
        block_co -= 8

    # Lane-dense geometry: pad N*L up to a multiple of 128.
    nl = n * length
    nl_pad = ((nl + 127) // 128) * 128
    # Pad C_in up to the packed-sublane granule so every im2col store and the
    # MXU operand tiles are fully aligned (zero rows/columns contribute 0).
    granule = 8 * (4 // jnp.dtype(mxu_dtype).itemsize)        # 8 f32 / 16 bf16
    c_in_pad = ((c_in + granule - 1) // granule) * granule

    # Channel-major input with a 2*pad lane halo -> every tap is one shifted,
    # in-bounds, full-width slice inside the kernel (no wrapper-side im2col).
    x_cm = jnp.transpose(x, (1, 0, 2)).reshape(c_in, nl)
    xw = jnp.zeros((c_in_pad, nl_pad + 2 * pad), x.dtype)
    xw = xw.at[:c_in, pad:pad + nl].set(x_cm)

    # Fold taps into the contraction: W'[co, k*C_in_pad + c] = W[co, c, k].
    w_fold = jnp.zeros((c_out, ksize, c_in_pad), weight.dtype)
    w_fold = w_fold.at[:, :, :c_in].set(jnp.transpose(weight, (0, 2, 1)))
    w2 = w_fold.reshape(c_out, ksize * c_in_pad).astype(mxu_dtype)
    g2 = gamma.reshape(c_out, 1).astype(jnp.float32)
    b2 = beta.reshape(c_out, 1).astype(jnp.float32)

    # VMEM budget: monolithic A slab + resident x + double-buffered W/out tiles.
    mxu_bytes = jnp.dtype(mxu_dtype).itemsize
    out_bytes = jnp.dtype(x.dtype).itemsize
    vmem_need = (ksize * c_in_pad * nl_pad * mxu_bytes
                 + c_in_pad * (nl_pad + 2 * pad) * x.dtype.itemsize
                 + 2 * (block_co * ksize * c_in_pad * mxu_bytes
                        + block_co * nl_pad * out_bytes)
                 + (2 << 20))
    # TODO(synk): for N*L too large for VMEM (notably v7x, 64 MiB), add a second
    # grid axis tiling N*L, accumulate per-channel sum/sumsq across tiles, and
    # normalize in a finalize pass instead of the monolithic slab.
    assert vmem_need <= 48 * 2**20, "N*L too large for monolithic im2col slab"
    vmem_limit = int(min(max(2 * vmem_need, 32 * 2**20), 56 * 2**20))

    kernel = functools.partial(
        _conv_bn_relu_kernel, length=length, ksize=ksize, pad=pad, eps=eps,
        nl_valid=nl)

    y = pl.pallas_call(
        kernel,
        out_shape=jax.ShapeDtypeStruct((c_out, nl_pad), x.dtype),
        grid_spec=pltpu.PrefetchScalarGridSpec(
            num_scalar_prefetch=0,
            grid=(c_out // block_co,),
            in_specs=[
                pl.BlockSpec((block_co, ksize * c_in_pad), lambda i: (i, 0)),
                pl.BlockSpec((block_co, 1), lambda i: (i, 0)),
                pl.BlockSpec((block_co, 1), lambda i: (i, 0)),
                # Grid-invariant input: raw ref + one manual DMA (single buffer).
                pl.BlockSpec(memory_space=pl.ANY),
            ],
            out_specs=pl.BlockSpec((block_co, nl_pad), lambda i: (i, 0)),
            scratch_shapes=[
                pltpu.VMEM((ksize * c_in_pad, nl_pad), mxu_dtype),    # im2col A
                pltpu.VMEM((c_in_pad, nl_pad + 2 * pad), x.dtype),    # x resident
                pltpu.SemaphoreType.DMA,
            ]),
        compiler_params=pltpu.CompilerParams(
            # "arbitrary": the im2col scratch is built once at program_id==0
            # and reused by later (sequential) C_out steps.
            dimension_semantics=("arbitrary",),
            vmem_limit_bytes=vmem_limit),
    )(w2, g2, b2, xw)

    y = y[:, :nl]                       # drop lane padding
    if channel_major_out:
        return y                        # (C_out, N*L): stack blocks w/o transposes
    # Layout plumbing only, at the network boundary.
    return jnp.transpose(y.reshape(c_out, n, length), (1, 0, 2))


def _reference(x, weight, bias, gamma, beta, eps=1e-5):
    """Pure-JAX reference mirroring the PyTorch block (identity dropout)."""
    pad = weight.shape[-1] // 2
    y = lax.conv_general_dilated(
        x, weight, window_strides=(1,), padding=[(pad, pad)],
        dimension_numbers=("NCH", "OIH", "NCH"))
    y = y + bias[None, :, None]
    mean = jnp.mean(y, axis=(0, 2), keepdims=True)
    var = jnp.mean((y - mean) ** 2, axis=(0, 2), keepdims=True)
    y = gamma[None, :, None] * (y - mean) * lax.rsqrt(var + eps) + beta[None, :, None]
    return jnp.maximum(y, 0.0)


if __name__ == "__main__":
    # Shapes consistent with the module: batch=2, input_dim=4, L=16,
    # hidden_dims=32, kernel_size=5.
    N, C_IN, L = 2, 4, 16
    C_OUT, K = 32, 5

    key = jax.random.PRNGKey(0)
    kx, kw, kb, kg, kbe = jax.random.split(key, 5)

    x = jax.random.normal(kx, (N, C_IN, L), dtype=jnp.float32)

    # Deterministic synthetic parameters (PyTorch Conv1d init bounds).
    bound = 1.0 / (C_IN * K) ** 0.5
    weight = jax.random.uniform(kw, (C_OUT, C_IN, K), jnp.float32,
                                minval=-bound, maxval=bound)
    bias = jax.random.uniform(kb, (C_OUT,), jnp.float32,
                              minval=-bound, maxval=bound)
    gamma = 1.0 + 0.1 * jax.random.normal(kg, (C_OUT,), dtype=jnp.float32)
    beta = 0.1 * jax.random.normal(kbe, (C_OUT,), dtype=jnp.float32)

    out = jax.block_until_ready(conv1d_bn_relu_dropout(x, weight, bias, gamma, beta))
    ref = jax.block_until_ready(_reference(x, weight, bias, gamma, beta))

    assert out.shape == (N, C_OUT, L) and out.dtype == jnp.float32
    # bf16 MXU operands with f32 accumulation: expected max |err| ~1e-2 vs the
    # f32 reference (operand rounding), so tolerance is bf16-level here.
    err = float(jnp.max(jnp.abs(out - ref)))
    assert jnp.allclose(out, ref, atol=4e-2, rtol=2e-2), err

    print("KERNEL_OK")
</pallas_src>

<mosaic_0001>
module attributes {stable_mosaic.version = 11 : i64} {
  func.func @_conv_bn_relu_kernel(%arg0: i32, %arg1: memref<32x80xbf16, #tpu.memory_space<vmem>>, %arg2: memref<32x1xf32, #tpu.memory_space<vmem>>, %arg3: memref<32x1xf32, #tpu.memory_space<vmem>>, %arg4: memref<16x132xf32, #tpu.memory_space<any>>, %arg5: memref<32x128xf32, #tpu.memory_space<vmem>>, %arg6: memref<80x128xbf16, #tpu.memory_space<vmem>>, %arg7: memref<16x132xf32, #tpu.memory_space<vmem>>, %arg8: memref<!tpu.dma_semaphore, #tpu.memory_space<semaphore_mem>>) attributes {dimension_semantics = [#tpu.dimension_semantics<arbitrary>], iteration_bounds = array<i64: 1>, scalar_prefetch = 0 : i64, scratch_operands = 3 : i64, tpu.core_type = #tpu.core_type<tc>, window_params = [{transform_indices = @transform_0, window_bounds = array<i64: 32, 80>}, {transform_indices = @transform_1, window_bounds = array<i64: 32, 1>}, {transform_indices = @transform_2, window_bounds = array<i64: 32, 1>}, {}, {transform_indices = @transform_4, window_bounds = array<i64: 32, 128>}]} {
    %c0_i32 = arith.constant 0 : i32
    %0 = arith.cmpi eq, %arg0, %c0_i32 : i32
    %1 = arith.extui %0 : i1 to i32
    %c0_i32_0 = arith.constant 0 : i32
    %2 = arith.cmpi ne, %1, %c0_i32_0 : i32
    scf.if %2 {
      tpu.enqueue_dma source(%arg4 : memref<16x132xf32, #tpu.memory_space<any>>) target(%arg7 : memref<16x132xf32, #tpu.memory_space<vmem>>) target_semaphore(%arg8 : memref<!tpu.dma_semaphore, #tpu.memory_space<semaphore_mem>>)
      tpu.wait_dma2 semaphore(%arg8 : memref<!tpu.dma_semaphore, #tpu.memory_space<semaphore_mem>>) src(%arg4 : memref<16x132xf32, #tpu.memory_space<any>>) dst(%arg7 : memref<16x132xf32, #tpu.memory_space<vmem>>)
      %34 = tpu.iota {dimensions = array<i32: 1>} : vector<16x128xi32>
      %c16_i32 = arith.constant 16 : i32
      %c0_i32_17 = arith.constant 0 : i32
      %35 = arith.cmpi eq, %c16_i32, %c0_i32_17 : i32
      %c1_i32 = arith.constant 1 : i32
      %36 = arith.select %35, %c1_i32, %c16_i32 : i32
      %37 = vector.broadcast %36 : i32 to vector<16x128xi32>
      %38 = arith.remsi %34, %37 : vector<16x128xi32>
      %c0_i32_18 = arith.constant 0 : i32
      %39 = vector.broadcast %c0_i32_18 : i32 to vector<16x128xi32>
      %40 = arith.cmpi ne, %38, %39 : vector<16x128xi32>
      %c0_i32_19 = arith.constant 0 : i32
      %41 = vector.broadcast %c0_i32_19 : i32 to vector<16x128xi32>
      %42 = arith.cmpi slt, %38, %41 : vector<16x128xi32>
      %c0_i32_20 = arith.constant 0 : i32
      %43 = arith.cmpi slt, %36, %c0_i32_20 : i32
      %44 = vector.broadcast %43 : i1 to vector<16x128xi1>
      %45 = vector.broadcast %44 : vector<16x128xi1> to vector<16x128xi1>
      %46 = arith.xori %42, %45 : vector<16x128xi1>
      %47 = arith.andi %46, %40 : vector<16x128xi1>
      %48 = vector.broadcast %36 : i32 to vector<16x128xi32>
      %49 = arith.addi %38, %48 : vector<16x128xi32>
      %50 = arith.select %47, %49, %38 : vector<16x128xi1>, vector<16x128xi32>
      %c0_21 = arith.constant 0 : index
      %c0_22 = arith.constant 0 : index
      %51 = vector.load %arg7[%c0_21, %c0_22] : memref<16x132xf32, #tpu.memory_space<vmem>>, vector<16x128xf32>
      %c-2_i32 = arith.constant -2 : i32
      %52 = vector.broadcast %c-2_i32 : i32 to vector<16x128xi32>
      %53 = arith.addi %50, %52 : vector<16x128xi32>
      %c0_i32_23 = arith.constant 0 : i32
      %54 = vector.broadcast %c0_i32_23 : i32 to vector<16x128xi32>
      %55 = arith.cmpi sge, %53, %54 : vector<16x128xi32>
      %c-2_i32_24 = arith.constant -2 : i32
      %56 = vector.broadcast %c-2_i32_24 : i32 to vector<16x128xi32>
      %57 = arith.addi %50, %56 : vector<16x128xi32>
      %c16_i32_25 = arith.constant 16 : i32
      %58 = vector.broadcast %c16_i32_25 : i32 to vector<16x128xi32>
      %59 = arith.cmpi slt, %57, %58 : vector<16x128xi32>
      %60 = arith.andi %55, %59 : vector<16x128xi1>
      %c32_i32 = arith.constant 32 : i32
      %61 = vector.broadcast %c32_i32 : i32 to vector<16x128xi32>
      %62 = arith.cmpi slt, %34, %61 : vector<16x128xi32>
      %63 = arith.andi %60, %62 : vector<16x128xi1>
      %cst_26 = arith.constant 0.000000e+00 : f32
      %64 = vector.broadcast %cst_26 : f32 to vector<16x128xf32>
      %65 = arith.select %63, %51, %64 : vector<16x128xi1>, vector<16x128xf32>
      %66 = arith.truncf %65 : vector<16x128xf32> to vector<16x128xbf16>
      %c0_27 = arith.constant 0 : index
      %c0_28 = arith.constant 0 : index
      %67 = vector.load %arg6[%c0_27, %c0_28] : memref<80x128xbf16, #tpu.memory_space<vmem>>, vector<16x128xbf16>
      tpu.vector_store %arg6[%c0_27, %c0_28], %66 {strides = array<i32>} : memref<80x128xbf16, #tpu.memory_space<vmem>>, vector<16x128xbf16>,
      %c0_29 = arith.constant 0 : index
      %c1 = arith.constant 1 : index
      %68 = vector.load %arg7[%c0_29, %c1] : memref<16x132xf32, #tpu.memory_space<vmem>>, vector<16x128xf32>
      %c-1_i32 = arith.constant -1 : i32
      %69 = vector.broadcast %c-1_i32 : i32 to vector<16x128xi32>
      %70 = arith.addi %50, %69 : vector<16x128xi32>
      %c0_i32_30 = arith.constant 0 : i32
      %71 = vector.broadcast %c0_i32_30 : i32 to vector<16x128xi32>
      %72 = arith.cmpi sge, %70, %71 : vector<16x128xi32>
      %c-1_i32_31 = arith.constant -1 : i32
      %73 = vector.broadcast %c-1_i32_31 : i32 to vector<16x128xi32>
      %74 = arith.addi %50, %73 : vector<16x128xi32>
      %c16_i32_32 = arith.constant 16 : i32
      %75 = vector.broadcast %c16_i32_32 : i32 to vector<16x128xi32>
      %76 = arith.cmpi slt, %74, %75 : vector<16x128xi32>
      %77 = arith.andi %72, %76 : vector<16x128xi1>
      %c32_i32_33 = arith.constant 32 : i32
      %78 = vector.broadcast %c32_i32_33 : i32 to vector<16x128xi32>
      %79 = arith.cmpi slt, %34, %78 : vector<16x128xi32>
      %80 = arith.andi %77, %79 : vector<16x128xi1>
      %cst_34 = arith.constant 0.000000e+00 : f32
      %81 = vector.broadcast %cst_34 : f32 to vector<16x128xf32>
      %82 = arith.select %80, %68, %81 : vector<16x128xi1>, vector<16x128xf32>
      %83 = arith.truncf %82 : vector<16x128xf32> to vector<16x128xbf16>
      %c16 = arith.constant 16 : index
      %c0_35 = arith.constant 0 : index
      %84 = vector.load %arg6[%c16, %c0_35] : memref<80x128xbf16, #tpu.memory_space<vmem>>, vector<16x128xbf16>
      tpu.vector_store %arg6[%c16, %c0_35], %83 {strides = array<i32>} : memref<80x128xbf16, #tpu.memory_space<vmem>>, vector<16x128xbf16>,
      %c0_36 = arith.constant 0 : index
      %c2 = arith.constant 2 : index
      %85 = vector.load %arg7[%c0_36, %c2] : memref<16x132xf32, #tpu.memory_space<vmem>>, vector<16x128xf32>
      %c0_i32_37 = arith.constant 0 : i32
      %86 = vector.broadcast %c0_i32_37 : i32 to vector<16x128xi32>
      %87 = arith.addi %50, %86 : vector<16x128xi32>
      %c0_i32_38 = arith.constant 0 : i32
      %88 = vector.broadcast %c0_i32_38 : i32 to vector<16x128xi32>
      %89 = arith.cmpi sge, %87, %88 : vector<16x128xi32>
      %c0_i32_39 = arith.constant 0 : i32
      %90 = vector.broadcast %c0_i32_39 : i32 to vector<16x128xi32>
      %91 = arith.addi %50, %90 : vector<16x128xi32>
      %c16_i32_40 = arith.constant 16 : i32
      %92 = vector.broadcast %c16_i32_40 : i32 to vector<16x128xi32>
      %93 = arith.cmpi slt, %91, %92 : vector<16x128xi32>
      %94 = arith.andi %89, %93 : vector<16x128xi1>
      %c32_i32_41 = arith.constant 32 : i32
      %95 = vector.broadcast %c32_i32_41 : i32 to vector<16x128xi32>
      %96 = arith.cmpi slt, %34, %95 : vector<16x128xi32>
      %97 = arith.andi %94, %96 : vector<16x128xi1>
      %cst_42 = arith.constant 0.000000e+00 : f32
      %98 = vector.broadcast %cst_42 : f32 to vector<16x128xf32>
      %99 = arith.select %97, %85, %98 : vector<16x128xi1>, vector<16x128xf32>
      %100 = arith.truncf %99 : vector<16x128xf32> to vector<16x128xbf16>
      %c32 = arith.constant 32 : index
      %c0_43 = arith.constant 0 : index
      %101 = vector.load %arg6[%c32, %c0_43] : memref<80x128xbf16, #tpu.memory_space<vmem>>, vector<16x128xbf16>
      tpu.vector_store %arg6[%c32, %c0_43], %100 {strides = array<i32>} : memref<80x128xbf16, #tpu.memory_space<vmem>>, vector<16x128xbf16>,
      %c0_44 = arith.constant 0 : index
      %c3 = arith.constant 3 : index
      %102 = vector.load %arg7[%c0_44, %c3] : memref<16x132xf32, #tpu.memory_space<vmem>>, vector<16x128xf32>
      %c1_i32_45 = arith.constant 1 : i32
      %103 = vector.broadcast %c1_i32_45 : i32 to vector<16x128xi32>
      %104 = arith.addi %50, %103 : vector<16x128xi32>
      %c0_i32_46 = arith.constant 0 : i32
      %105 = vector.broadcast %c0_i32_46 : i32 to vector<16x128xi32>
      %106 = arith.cmpi sge, %104, %105 : vector<16x128xi32>
      %c1_i32_47 = arith.constant 1 : i32
      %107 = vector.broadcast %c1_i32_47 : i32 to vector<16x128xi32>
      %108 = arith.addi %50, %107 : vector<16x128xi32>
      %c16_i32_48 = arith.constant 16 : i32
      %109 = vector.broadcast %c16_i32_48 : i32 to vector<16x128xi32>
      %110 = arith.cmpi slt, %108, %109 : vector<16x128xi32>
      %111 = arith.andi %106, %110 : vector<16x128xi1>
      %c32_i32_49 = arith.constant 32 : i32
      %112 = vector.broadcast %c32_i32_49 : i32 to vector<16x128xi32>
      %113 = arith.cmpi slt, %34, %112 : vector<16x128xi32>
      %114 = arith.andi %111, %113 : vector<16x128xi1>
      %cst_50 = arith.constant 0.000000e+00 : f32
      %115 = vector.broadcast %cst_50 : f32 to vector<16x128xf32>
      %116 = arith.select %114, %102, %115 : vector<16x128xi1>, vector<16x128xf32>
      %117 = arith.truncf %116 : vector<16x128xf32> to vector<16x128xbf16>
      %c48 = arith.constant 48 : index
      %c0_51 = arith.constant 0 : index
      %118 = vector.load %arg6[%c48, %c0_51] : memref<80x128xbf16, #tpu.memory_space<vmem>>, vector<16x128xbf16>
      tpu.vector_store %arg6[%c48, %c0_51], %117 {strides = array<i32>} : memref<80x128xbf16, #tpu.memory_space<vmem>>, vector<16x128xbf16>,
      %c0_52 = arith.constant 0 : index
      %c4 = arith.constant 4 : index
      %119 = vector.load %arg7[%c0_52, %c4] : memref<16x132xf32, #tpu.memory_space<vmem>>, vector<16x128xf32>
      %c2_i32 = arith.constant 2 : i32
      %120 = vector.broadcast %c2_i32 : i32 to vector<16x128xi32>
      %121 = arith.addi %50, %120 : vector<16x128xi32>
      %c0_i32_53 = arith.constant 0 : i32
      %122 = vector.broadcast %c0_i32_53 : i32 to vector<16x128xi32>
      %123 = arith.cmpi sge, %121, %122 : vector<16x128xi32>
      %c2_i32_54 = arith.constant 2 : i32
      %124 = vector.broadcast %c2_i32_54 : i32 to vector<16x128xi32>
      %125 = arith.addi %50, %124 : vector<16x128xi32>
      %c16_i32_55 = arith.constant 16 : i32
      %126 = vector.broadcast %c16_i32_55 : i32 to vector<16x128xi32>
      %127 = arith.cmpi slt, %125, %126 : vector<16x128xi32>
      %128 = arith.andi %123, %127 : vector<16x128xi1>
      %c32_i32_56 = arith.constant 32 : i32
      %129 = vector.broadcast %c32_i32_56 : i32 to vector<16x128xi32>
      %130 = arith.cmpi slt, %34, %129 : vector<16x128xi32>
      %131 = arith.andi %128, %130 : vector<16x128xi1>
      %cst_57 = arith.constant 0.000000e+00 : f32
      %132 = vector.broadcast %cst_57 : f32 to vector<16x128xf32>
      %133 = arith.select %131, %119, %132 : vector<16x128xi1>, vector<16x128xf32>
      %134 = arith.truncf %133 : vector<16x128xf32> to vector<16x128xbf16>
      %c64 = arith.constant 64 : index
      %c0_58 = arith.constant 0 : index
      %135 = vector.load %arg6[%c64, %c0_58] : memref<80x128xbf16, #tpu.memory_space<vmem>>, vector<16x128xbf16>
      tpu.vector_store %arg6[%c64, %c0_58], %134 {strides = array<i32>} : memref<80x128xbf16, #tpu.memory_space<vmem>>, vector<16x128xbf16>,
    } else {
    }
    %c0 = arith.constant 0 : index
    %c0_1 = arith.constant 0 : index
    %3 = vector.load %arg1[%c0, %c0_1] : memref<32x80xbf16, #tpu.memory_space<vmem>>, vector<32x80xbf16>
    %c0_2 = arith.constant 0 : index
    %c0_3 = arith.constant 0 : index
    %4 = vector.load %arg6[%c0_2, %c0_3] : memref<80x128xbf16, #tpu.memory_space<vmem>>, vector<80x128xbf16>
    %cst = arith.constant dense<0.000000e+00> : vector<32x128xf32>
    %5 = tpu.matmul %3, %4, %cst {dimension_numbers = #tpu.dot_dimension_numbers<[1], [0], [0], [1], [0, 0, 1, 1], [], []>} : vector<32x80xbf16>, vector<80x128xbf16>, vector<32x128xf32> -> vector<32x128xf32>
    %cst_4 = arith.constant dense<0.000000e+00> : vector<32xf32>
    %6 = vector.multi_reduction <add>, %5, %cst_4 [1] : vector<32x128xf32> to vector<32xf32>
    %7 = vector.shape_cast %6 : vector<32xf32> to vector<32x1xf32>
    %cst_5 = arith.constant 3.125000e-02 : f32
    %8 = vector.broadcast %cst_5 : f32 to vector<32x1xf32>
    %9 = arith.mulf %7, %8 : vector<32x1xf32>
    %10 = arith.mulf %5, %5 : vector<32x128xf32>
    %cst_6 = arith.constant dense<0.000000e+00> : vector<32xf32>
    %11 = vector.multi_reduction <add>, %10, %cst_6 [1] : vector<32x128xf32> to vector<32xf32>
    %12 = vector.shape_cast %11 : vector<32xf32> to vector<32x1xf32>
    %cst_7 = arith.constant 3.125000e-02 : f32
    %13 = vector.broadcast %cst_7 : f32 to vector<32x1xf32>
    %14 = arith.mulf %12, %13 : vector<32x1xf32>
    %15 = arith.mulf %9, %9 : vector<32x1xf32>
    %16 = arith.subf %14, %15 : vector<32x1xf32>
    %cst_8 = arith.constant 0.000000e+00 : f32
    %17 = vector.broadcast %cst_8 : f32 to vector<32x1xf32>
    %18 = arith.maximumf %16, %17 : vector<32x1xf32>
    %c0_9 = arith.constant 0 : index
    %c0_10 = arith.constant 0 : index
    %19 = vector.load %arg2[%c0_9, %c0_10] : memref<32x1xf32, #tpu.memory_space<vmem>>, vector<32x1xf32>
    %cst_11 = arith.constant 9.99999974E-6 : f32
    %20 = vector.broadcast %cst_11 : f32 to vector<32x1xf32>
    %21 = arith.addf %18, %20 : vector<32x1xf32>
    %22 = math.rsqrt %21 : vector<32x1xf32>
    %23 = arith.mulf %19, %22 : vector<32x1xf32>
    %c0_12 = arith.constant 0 : index
    %c0_13 = arith.constant 0 : index
    %24 = vector.load %arg3[%c0_12, %c0_13] : memref<32x1xf32, #tpu.memory_space<vmem>>, vector<32x1xf32>
    %25 = arith.mulf %23, %9 : vector<32x1xf32>
    %26 = arith.subf %24, %25 : vector<32x1xf32>
    %27 = vector.broadcast %23 : vector<32x1xf32> to vector<32x128xf32>
    %28 = arith.mulf %5, %27 : vector<32x128xf32>
    %29 = vector.broadcast %26 : vector<32x1xf32> to vector<32x128xf32>
    %30 = arith.addf %28, %29 : vector<32x128xf32>
    %cst_14 = arith.constant 0.000000e+00 : f32
    %31 = vector.broadcast %cst_14 : f32 to vector<32x128xf32>
    %32 = arith.maximumf %30, %31 : vector<32x128xf32>
    %c0_15 = arith.constant 0 : index
    %c0_16 = arith.constant 0 : index
    %33 = vector.load %arg5[%c0_15, %c0_16] : memref<32x128xf32, #tpu.memory_space<vmem>>, vector<32x128xf32>
    tpu.vector_store %arg5[%c0_15, %c0_16], %32 {strides = array<i32>} : memref<32x128xf32, #tpu.memory_space<vmem>>, vector<32x128xf32>,
    return
  }
  func.func @transform_0(%arg0: i32) -> (i32, i32) {
    %c0_i32 = arith.constant 0 : i32
    %c0_i32_0 = arith.constant 0 : i32
    return %arg0, %c0_i32 : i32, i32
  }
  func.func @transform_1(%arg0: i32) -> (i32, i32) {
    %c0_i32 = arith.constant 0 : i32
    %c0_i32_0 = arith.constant 0 : i32
    return %arg0, %c0_i32 : i32, i32
  }
  func.func @transform_2(%arg0: i32) -> (i32, i32) {
    %c0_i32 = arith.constant 0 : i32
    %c0_i32_0 = arith.constant 0 : i32
    return %arg0, %c0_i32 : i32, i32
  }
  func.func @transform_4(%arg0: i32) -> (i32, i32) {
    %c0_i32 = arith.constant 0 : i32
    %c0_i32_0 = arith.constant 0 : i32
    return %arg0, %c0_i32 : i32, i32
  }
}

</mosaic_0001>

<bundles_post_ra>
// kernel: tpu_custom_call.1
= control target key start
LH: loop header
LB: loop body
LE: loop exit
PB: predicated region body
PF: predicated region fallthrough
CT: control target
= control target key end

     0   :  { %9 = vsyncpa [#allocation6], 0  ;;  %s722_s0 = inlined_call_operand.vmem [shape: bf16[32,80], index: 0, kind: input, shape index: {}]   ;;  %s723_s1 = inlined_call_operand.vmem [shape: f32[32,1], index: 1, kind: input, shape index: {}]   ;;  %s724_s2 = inlined_call_operand.vmem [shape: f32[32,1], index: 2, kind: input, shape index: {}]   ;;  %s725_s3 = inlined_call_operand.vmem [shape: f32[16,132], index: 3, kind: input, shape index: {}]   ;;  %s726_s4 = inlined_call_operand.hbm [shape: f32[32,128], index: 4, kind: output, shape index: {}]  }
   0x1   :  { %v53_v0 = vld [vmem:[%s725_s3] sm:$0xff]  ;;  %v55_v1 = vld [vmem:[%s725_s3 + $0x8] sm:$0xff]  ;;  %v57_v2 = vld [vmem:[%s725_s3 + $0x10] sm:$0xff] }
   0x2   :  { %v59_v3 = vld [vmem:[%s725_s3 + $0x18] sm:$0xff] }
   0x3   :  { %68 = vsyncadd [#allocation4], 512  ;;  %v506_v4 = vpack.i.bf16 %v55_v1, %v53_v0 }
   0x4   :  { %570 = dma.done.wait [#allocation4], 512 }
   0x5   :  { %571 = vsyncadd [#allocation4], 4294966784  ;;  %s574_s23 = smov 126   ;;  %s575_s24 = smov 127   ;;  %v511_v5 = vpack.i.bf16 %v59_v3, %v57_v2  ;;  %v73_v6 = vlaneseq  ;;  %v453_v12 = vpack.c.bf16 %v57_v2, %v53_v0  ;;  %v538_v14 = vld [vmem:[%s722_s0] sm:$0xff]   ;;  %vm237_vm4 = vcmask 654336  }
   0x6   :  { %507 = vrot.lane.b32.xlu1 %v506_v4, %s574_s23  ;;  %497 = vrot.lane.b32.xlu0 %v506_v4, %s575_s24  ;;  %s576_s3 = smov 125   ;;  %s577_s27 = smov 124   ;;  %vm149_vm11 = vcmask 1031168   ;;  %vm120_vm12 = vcmask 1039360   ;;  %vm179_vm14 = vcmask 1022976   ;;  %v539_v55 = vld [vmem:[%s722_s0 + $0x8] sm:$0xff]  }
   0x7   :  { %v74_v7 = vand.u32 127, %v73_v6  ;;  %484 = vmatprep.mubr.msk.bf16.mxu0 %vm237_vm4, %v538_v14  ;;  %v578_v0 = vmov 0  }
   0x8   :  { %536 = vset.pattern.permute.xlu1 %v578_v0  ;;  %537 = vset.pattern.permute.xlu0 %v578_v0 }
   0x9   :  { %v79_v8 = vand.u32 15, %v74_v7  ;;  %vm93_vm0 = vcmp.lt.s32.totalorder %v74_v7, 32 }
   0xa   :  { %512 = vrot.lane.b32.xlu1 %v511_v5, %s574_s23  ;;  %502 = vrot.lane.b32.xlu0 %v511_v5, %s575_s24  ;;  %vm644_vm15 = vmpackc.low %vm93_vm0, %vm93_vm0 }
   0xb   :  { %v89_v9 = vadd.s32 4294967294, %v79_v8  ;;  %v103_v10 = vadd.s32 4294967295, %v79_v8  ;;  %v162_v11 = vadd.s32 1, %v79_v8  ;;  %v192_v13 = vadd.s32 2, %v79_v8 }
   0xd   :  { %vm90_vm1 = vcmp.ge.s32.totalorder %v89_v9, 0  ;;  %vm104_vm2 = vcmp.ge.s32.totalorder %v103_v10, 0  ;;  %vm164_vm6 = vcmp.lt.s32.totalorder %v162_v11, 16  ;;  %vm194_vm8 = vcmp.lt.s32.totalorder %v192_v13, 16 }
   0xe   :  { %522 = vrot.lane.b32.xlu1 %v511_v5, %s576_s3  ;;  %517 = vrot.lane.b32.xlu0 %v506_v4, %s576_s3  ;;  %vm94_vm3 = vmand %vm90_vm1, %vm93_vm0  ;;  %vm209_vm1 = vcmask 1014784  }
   0xf   :  { %vm452_vm5 = vmpackc.low %vm94_vm3, %vm94_vm3 }
  0x10   :  { %474 = vmatprep.subr.msk.bf16.mxu0 %vm452_vm5, %v453_v12  ;;  %vm624_vm7 = vmand %vm104_vm2, %vm93_vm0 }
  0x11   :  { %475 = vmatpush3.bf16.msk.msra.mxu0 %vm452_vm5, %v453_v12  ;;  %vm630_vm9 = vmand %vm164_vm6, %vm93_vm0 }
  0x12   :  { %532 = vrot.lane.b32.xlu1 %v511_v5, %s577_s27  ;;  %527 = vrot.lane.b32.xlu0 %v506_v4, %s577_s27  ;;  %vm635_vm10 = vmand %vm194_vm8, %vm93_vm0 }
  0x13   :  { %vm455_vm13 = vmpackc.low %vm624_vm7, %vm624_vm7 }
  0x14   :  { %vm461_vm0 = vmpackc.low %vm630_vm9, %vm630_vm9 }
  0x15   :  { %vm464_vm2 = vmpackc.low %vm635_vm10, %vm635_vm10 }
  0x78   :  { %v508_v18 = vpop.permute.xlu1 %507  ;;  %v498_v19 = vpop.permute.xlu0 %497 }
  0x79   :  { %v510_v20 = vunpack.i.h.bf16 %v508_v18  ;;  %v509_v21 = vunpack.i.l.bf16 %v508_v18  ;;  %v500_v22 = vunpack.i.h.bf16 %v498_v19  ;;  %v499_v23 = vunpack.i.l.bf16 %v498_v19 }
  0x7b   :  { %v150_v30 = vsel %vm149_vm11, %v509_v21, %v510_v20  ;;  %v121_v31 = vsel %vm120_vm12, %v499_v23, %v500_v22 }
  0x7c   :  { %v513_v24 = vpop.permute.xlu1 %512  ;;  %v503_v25 = vpop.permute.xlu0 %502 }
  0x7d   :  { %v515_v26 = vunpack.i.h.bf16 %v513_v24  ;;  %v514_v27 = vunpack.i.l.bf16 %v513_v24  ;;  %v505_v28 = vunpack.i.h.bf16 %v503_v25  ;;  %v504_v29 = vunpack.i.l.bf16 %v503_v25 }
  0x7f   :  { %v151_v32 = vsel %vm149_vm11, %v514_v27, %v515_v26  ;;  %v122_v33 = vsel %vm120_vm12, %v504_v29, %v505_v28 }
  0x80   :  { %v456_v34 = vpack.c.bf16 %v122_v33, %v121_v31  ;;  %v523_v35 = vpop.permute.xlu1 %522  ;;  %v518_v36 = vpop.permute.xlu0 %517  ;;  %v459_v42 = vpack.c.bf16 %v151_v32, %v150_v30  ;;  %v333_v33 = vld [vmem:[%s723_s1] sm:$0xff] }
  0x81   :  { %v525_v37 = vunpack.i.h.bf16 %v523_v35  ;;  %v524_v38 = vunpack.i.l.bf16 %v523_v35  ;;  %v520_v39 = vunpack.i.h.bf16 %v518_v36  ;;  %v519_v40 = vunpack.i.l.bf16 %v518_v36  ;;  %v335_v36 = vld [vmem:[%s723_s1 + $0x10] sm:$0xff] }
  0x82   :  { %476 = vmatprep.subr.msk.bf16.mxu0 %vm455_vm13, %v456_v34 }
  0x83   :  { %477 = vmatpush3.bf16.msk.msra.mxu0 %vm455_vm13, %v456_v34  ;;  %v181_v43 = vsel %vm179_vm14, %v524_v38, %v525_v37  ;;  %v180_v44 = vsel %vm179_vm14, %v519_v40, %v520_v39  ;;  %v334_v37 = vld [vmem:[%s723_s1 + $0x8] sm:$0xff] }
  0x84   :  { %v462_v45 = vpack.c.bf16 %v181_v43, %v180_v44  ;;  %478 = vmatprep.subr.msk.bf16.mxu0 %vm644_vm15, %v459_v42  ;;  %v533_v46 = vpop.permute.xlu1 %532  ;;  %v528_v47 = vpop.permute.xlu0 %527 }
  0x85   :  { %v535_v48 = vunpack.i.h.bf16 %v533_v46  ;;  %v534_v49 = vunpack.i.l.bf16 %v533_v46  ;;  %v530_v50 = vunpack.i.h.bf16 %v528_v47  ;;  %v529_v51 = vunpack.i.l.bf16 %v528_v47  ;;  %v351_v46 = vld [vmem:[%s724_s2 + $0x10] sm:$0xff] }
  0x87   :  { %479 = vmatpush3.bf16.msk.msra.mxu0 %vm644_vm15, %v459_v42  ;;  %v211_v52 = vsel %vm209_vm1, %v534_v49, %v535_v48  ;;  %v210_v53 = vsel %vm209_vm1, %v529_v51, %v530_v50  ;;  %v336_v42 = vld [vmem:[%s723_s1 + $0x18] sm:$0xff]  ;;  %v349_v49 = vld [vmem:[%s724_s2] sm:$0xff] }
  0x88   :  { %v465_v54 = vpack.c.bf16 %v211_v52, %v210_v53  ;;  %480 = vmatprep.subr.msk.bf16.mxu0 %vm461_vm0, %v462_v45  ;;  %v350_v52 = vld [vmem:[%s724_s2 + $0x8] sm:$0xff] }
  0x8b   :  { %481 = vmatpush3.bf16.msk.msra.mxu0 %vm461_vm0, %v462_v45 }
  0x8c   :  { %482 = vmatprep.subr.msk.bf16.mxu0 %vm464_vm2, %v465_v54 }
  0x8f   :  { %483 = vmatpush3.bf16.msk.msra.mxu0 %vm464_vm2, %v465_v54 }
  0x92   :  { %485 = vmatmul.mubr.msk.bf16.vlgmr.msra.gmra.mrb[0].mxu0 %vm237_vm4, %v539_v55  ;;  %v352_v55 = vld [vmem:[%s724_s2 + $0x18] sm:$0xff]  ;;  %s579_s2 = smov [#allocation5]  }
  0x93   :  { %s422_s18 = sshll.u32 %s579_s2, 4  ;;  %s423_s18 = int_to_ptr.vmem [resolvable:$true] %s422_s18 }
  0x94   :  { %s548_s19 = scalar_lea.vmem %s423_s18, 512  ;;  %p553_p1 = scmp.lt.s32.totalorder %s423_s18, %s423_s18 }
  0x95   :  { %p549_p0 = scmp.ne.s32.totalorder %s423_s18, %s548_s19  ;;  %p554_p2 = scmp.lt.s32.totalorder %s548_s19, %s548_s19 }
  0x97   :  { %p555_p3 = por %p554_p2, %p553_p1 }
  0x99   :  { %p556_p4 = pnand %p555_p3, %p549_p0 }
 0x165   :  { %v662_v56 = vpop.f32.mrb[0].mxu0 }
 0x166   :  { %297 = vadd.xlane.f32.xlu0 %v662_v56  ;;  %v665_v57 = vpop.f32.mrb[1].mxu0  ;;  %v307_v61 = vmul.f32 %v662_v56, %v662_v56 }
 0x167   :  { %v667_v58 = vpop.f32.mrb[2].mxu0  ;;  %v305_v60 = vmul.f32 %v665_v57, %v665_v57 }
 0x168   :  { %v669_v59 = vpop.f32.mrb[3].mxu0  ;;  %v308_v63 = vmul.f32 %v667_v58, %v667_v58 }
 0x169   :  { %295 = vadd.xlane.f32.xlu1 %v669_v59  ;;  %v306_v62 = vmul.f32 %v669_v59, %v669_v59 }
 0x16a   :  { %293 = vadd.xlane.f32.xlu0 %v665_v57 }
 0x16d   :  { %309 = vadd.xlane.f32.xlu1 %v305_v60 }
 0x16e   :  { %299 = vadd.xlane.f32.xlu0 %v667_v58 }
 0x171   :  { %313 = vadd.xlane.f32.xlu1 %v307_v61 }
 0x172   :  { %311 = vadd.xlane.f32.xlu0 %v306_v62 }
 0x176   :  { %315 = vadd.xlane.f32.xlu0 %v308_v63 }
 0x1f3   :  { %v298_v1 = vpop.xlane.xlu0 %297 }
 0x1f4   :  { %v303_v7 = vmul.f32 0.03125, %v298_v1 }
 0x1f6   :  { %v296_v2 = vpop.xlane.xlu1 %295  ;;  %v323_v13 = vmul.f32 %v303_v7, %v303_v7 }
 0x1f7   :  { %v294_v3 = vpop.xlane.xlu0 %293  ;;  %v302_v10 = vmul.f32 0.03125, %v296_v2 }
 0x1f8   :  { %v301_v4 = vmul.f32 0.03125, %v294_v3 }
 0x1f9   :  { %v322_v17 = vmul.f32 %v302_v10, %v302_v10 }
 0x1fa   :  { %v321_v5 = vmul.f32 %v301_v4, %v301_v4  ;;  %v310_v6 = vpop.xlane.xlu1 %309 }
 0x1fb   :  { %v317_v8 = vmul.f32 0.03125, %v310_v6  ;;  %v300_v9 = vpop.xlane.xlu0 %299 }
 0x1fc   :  { %v304_v18 = vmul.f32 0.03125, %v300_v9 }
 0x1fd   :  { %v325_v11 = vsub.f32 %v317_v8, %v321_v5 }
 0x1fe   :  { %v314_v12 = vpop.xlane.xlu1 %313  ;;  %v324_v25 = vmul.f32 %v304_v18, %v304_v18 }
 0x1ff   :  { %v329_v14 = vmax.f32 %v325_v11, 0.0  ;;  %v319_v15 = vmul.f32 0.03125, %v314_v12  ;;  %v312_v16 = vpop.xlane.xlu0 %311 }
 0x200   :  { %v318_v19 = vmul.f32 0.03125, %v312_v16 }
 0x201   :  { %v337_v20 = vadd.f32 1e-05, %v329_v14  ;;  %v327_v21 = vsub.f32 %v319_v15, %v323_v13 }
 0x202   :  { %v326_v22 = vsub.f32 %v318_v19, %v322_v17 }
 0x203   :  { %540 = vrsqrt.f32 %v337_v20  ;;  %v331_v23 = vmax.f32 %v327_v21, 0.0  ;;  %v316_v24 = vpop.xlane.xlu0 %315 }
 0x204   :  { %v330_v26 = vmax.f32 %v326_v22, 0.0  ;;  %v320_v27 = vmul.f32 0.03125, %v316_v24 }
 0x205   :  { %v339_v28 = vadd.f32 1e-05, %v331_v23 }
 0x206   :  { %v338_v29 = vadd.f32 1e-05, %v330_v26  ;;  %v328_v30 = vsub.f32 %v320_v27, %v324_v25 }
 0x207   :  { %542 = vrsqrt.f32 %v339_v28 }
 0x208   :  { %544 = vrsqrt.f32 %v338_v29  ;;  %v332_v31 = vmax.f32 %v328_v30, 0.0 }
 0x20a   :  { %v340_v32 = vadd.f32 1e-05, %v332_v31 }
 0x20c   :  { %546 = vrsqrt.f32 %v340_v32 }
 0x20d   :  { %v541_v34 = vpop.eup %540 }
 0x20e   :  { %v345_v35 = vmul.f32 %v541_v34, %v333_v33 }
 0x210   :  { %363 = vperm.xlu1 %536, %v345_v35   ;;  %v353_v48 = vmul.f32 %v345_v35, %v301_v4 }
 0x211   :  { %v543_v38 = vpop.eup %542 }
 0x212   :  { %v545_v39 = vpop.eup %544  ;;  %v347_v40 = vmul.f32 %v543_v38, %v335_v36  ;;  %v357_v50 = vsub.f32 %v349_v49, %v353_v48 }
 0x213   :  { %v346_v41 = vmul.f32 %v545_v39, %v334_v37 }
 0x214   :  { %373 = vperm.xlu1 %536, %v347_v40   ;;  %v355_v45 = vmul.f32 %v347_v40, %v303_v7 }
 0x215   :  { %368 = vperm.xlu0 %537, %v346_v41   ;;  %v354_v51 = vmul.f32 %v346_v41, %v302_v10 }
 0x216   :  { %v547_v43 = vpop.eup %546  ;;  %v359_v47 = vsub.f32 %v351_v46, %v355_v45 }
 0x217   :  { %v348_v44 = vmul.f32 %v547_v43, %v336_v42  ;;  %v358_v53 = vsub.f32 %v350_v52, %v354_v51 }
 0x219   :  { %378 = vperm.xlu1 %536, %v348_v44   ;;  %v356_v54 = vmul.f32 %v348_v44, %v304_v18 }
 0x21b   :  { %v360_v60 = vsub.f32 %v352_v55, %v356_v54 }
 0x21d   :  { %397 = vperm.xlu1 %536, %v359_v47  }
 0x221   :  { %387 = vperm.xlu1 %536, %v357_v50  }
 0x225   :  { %392 = vperm.xlu1 %536, %v358_v53  }
 0x229   :  { %402 = vperm.xlu1 %536, %v360_v60  }
 0x28f   :  { %v364_v61 = vpop.permute.xlu1 %363 }
 0x290   :  { %v381_v3 = vmul.f32 %v364_v61, %v665_v57 }
 0x293   :  { %v374_v62 = vpop.permute.xlu1 %373 }
 0x294   :  { %v383_v0 = vmul.f32 %v662_v56, %v374_v62  ;;  %v369_v5 = vpop.permute.xlu0 %368 }
 0x295   :  { %v382_v8 = vmul.f32 %v369_v5, %v669_v59 }
 0x298   :  { %v379_v63 = vpop.permute.xlu1 %378 }
 0x299   :  { %v384_v12 = vmul.f32 %v667_v58, %v379_v63 }
 0x29c   :  { %v398_v1 = vpop.permute.xlu1 %397 }
 0x29d   :  { %v407_v2 = vadd.f32 %v398_v1, %v383_v0 }
 0x29f   :  { %v411_v4 = vmax.f32 %v407_v2, 0.0 }
 0x2a0   :  { %v388_v6 = vpop.permute.xlu1 %387 }
 0x2a1   :  { %415 = vst [vmem:[#allocation5 + $0x10] sm:$0xff] %v411_v4  ;;  %v405_v7 = vadd.f32 %v388_v6, %v381_v3 }
 0x2a3   :  { %v409_v9 = vmax.f32 %v405_v7, 0.0 }
 0x2a4   :  { %v393_v10 = vpop.permute.xlu1 %392 }
 0x2a5   :  { %413 = vst [vmem:[#allocation5] sm:$0xff] %v409_v9  ;;  %v406_v11 = vadd.f32 %v393_v10, %v382_v8 }
 0x2a7   :  { %v410_v13 = vmax.f32 %v406_v11, 0.0 }
 0x2a8   :  { %v403_v56 = vpop.permute.xlu1 %402 }
 0x2a9   :  { %414 = vst [vmem:[#allocation5 + $0x8] sm:$0xff] %v410_v13  ;;  %v408_v14 = vadd.f32 %v403_v56, %v384_v12 }
 0x2ab   :  { %v412_v57 = vmax.f32 %v408_v14, 0.0 }
 0x2ad   :  { %416 = vst [vmem:[#allocation5 + $0x18] sm:$0xff] %v412_v57 }
 0x2ae   :  { %559 = shalt.err (!%p556_p4)
}
 0x2af   :  { %s560_s22 = scalar_lea.hbm %s726_s4, 512 }
 0x2b0   :  { %p561_p5 = scmp.ne.s32.totalorder %s726_s4, %s560_s22  ;;  %p564_p6 = scmp.lt.u32.totalorder %s560_s22, %s726_s4 }
 0x2b2   :  { %p566_p7 = pnand %p564_p6, %p561_p5 }
 0x2b4   :  { %569 = shalt.err (!%p566_p7)
}
 0x2b5   :  { %s580_s26 = smov 128   ;;  %s581_s27 = smov 8  }
 0x2b6   :  { %428 = dma.vmem_to_hbm [thread:$0]  %s423_s18, 512, %s726_s4, [#allocation6], %s580_s26, %s580_s26, %s581_s27  }
 0x2b7   :  { %572 = dma.done.wait [#allocation6], 512  }
 0x2b8   :  { %573 = vsyncadd [#allocation6], 4294966784 }
 0x2b9   :  { %432 = vsyncpa [#allocation6], 1 }
 0x2ba   :  { %433 = vsyncmov [#allocation4] }
 0x2bd   :  { %s434_s0 = vpop.sfrf %433 }
 0x2be   :  { %p451_p8 = scmp.ne.s32.totalorder %s434_s0, 0 }
 0x2c0   :  { %438 = shalt.err (%p451_p8)  }

</bundles_post_ra>
